<compile_context>
chip_gen: v7x
topology: tpu7x:2x2x1
jax: 0.10.0
libtpu: 0.0.40
codegen_flags: <defaults>
</compile_context>

<pallas_src>
import functools

import jax
import jax.numpy as jnp
from jax import lax
from jax.experimental import pallas as pl
from jax.experimental.pallas import tpu as pltpu


def _round_up(n, m):
    return ((n + m - 1) // m) * m


def value_mlp_kernel(x_ref, w1_ref, w2_ref, w3_ref, b_ref, ot_ref, *,
                     hidden_size, output_size):
    # x arrives in its natural (tb, input_size) layout; cast to the MXU
    # operand dtype here (VMEM), not in the wrapper (HBM).
    x = x_ref[...].astype(jnp.bfloat16)                                # (TB, in)

    # Packed biases: b_all = [b1; b2; b3] as a (2H+out, 1) f32 column.
    b1 = b_ref[0:hidden_size, :]                                       # (H, 1)
    b2 = b_ref[hidden_size:2 * hidden_size, :]                         # (H, 1)
    b3 = b_ref[2 * hidden_size:2 * hidden_size + output_size, :]       # (out, 1)

    # fc1 + ReLU: contract x's feature axis against w1's in-features so the
    # result is features-major (H, TB) with batch on the lane axis.
    h1 = lax.dot_general(w1_ref[...], x,
                         dimension_numbers=(((1,), (1,)), ((), ())),
                         preferred_element_type=jnp.float32)           # (H, TB)
    h1 = jnp.maximum(h1 + b1, 0.0)

    # fc2 + ReLU
    h2 = jnp.dot(w2_ref[...], h1.astype(jnp.bfloat16),
                 preferred_element_type=jnp.float32)                   # (H, TB)
    h2 = jnp.maximum(h2 + b2, 0.0)

    # fc3 (no activation) -> lane-dense (out, TB) store.
    out = jnp.dot(w3_ref[...], h2.astype(jnp.bfloat16),
                  preferred_element_type=jnp.float32)                  # (out, TB)
    ot_ref[...] = (out + b3).astype(ot_ref.dtype)


def value_forward(x, params, *, block_b=1024):
    """x: (B, input_size) float32. Returns (B, output_size) float32."""
    assert block_b % 128 == 0 and block_b >= 256
    B, input_size = x.shape
    w1t, w2t, w3t, b_all = (params["w1t"], params["w2t"], params["w3t"],
                            params["b_all"])
    hidden_size = w1t.shape[0]
    output_size = w3t.shape[0]

    # Tile selection:
    #  * lane axis (batch) always a multiple of 128 -> lane-dense stores,
    #  * for B >= 256 use >= 2 tiles so v7x can shard across both TensorCores,
    #  * cap at block_b (per-tile VMEM is tiny, so big tiles are safe).
    b128 = _round_up(B, 128)
    if b128 <= block_b:
        if B >= 256:
            tb = _round_up(pl.cdiv(B, 2), 128)
        else:
            tb = b128
    else:
        tb = block_b
    grid_n = pl.cdiv(B, tb)
    b_pad = grid_n * tb

    # Only pad the batch dim when it is ragged; x otherwise streams as-is
    # (natural layout, no transpose/cast copy in HBM).
    if b_pad != B:
        x = jnp.pad(x, ((0, b_pad - B), (0, 0)))

    kernel = functools.partial(value_mlp_kernel,
                               hidden_size=hidden_size,
                               output_size=output_size)

    flops = 2 * b_pad * (input_size * hidden_size
                         + hidden_size * hidden_size
                         + hidden_size * output_size)
    bytes_accessed = (b_pad * input_size * 4                 # x tiles (f32)
                      + (w1t.size + w2t.size + w3t.size) * 2  # bf16 weights
                      + b_all.size * 4
                      + output_size * b_pad * 4)             # output (f32)

    out_t = pl.pallas_call(
        kernel,
        out_shape=jax.ShapeDtypeStruct((output_size, b_pad), jnp.float32),
        grid=(grid_n,),
        in_specs=[
            pl.BlockSpec((tb, input_size), lambda i: (i, 0)),  # x batch tile
            pl.BlockSpec(w1t.shape, lambda i: (0, 0)),         # VMEM-resident
            pl.BlockSpec(w2t.shape, lambda i: (0, 0)),
            pl.BlockSpec(w3t.shape, lambda i: (0, 0)),
            pl.BlockSpec(b_all.shape, lambda i: (0, 0)),
        ],
        out_specs=pl.BlockSpec((output_size, tb), lambda i: (0, i)),
        compiler_params=pltpu.CompilerParams(
            dimension_semantics=("parallel",),
            vmem_limit_bytes=32 * 1024 * 1024),
        cost_estimate=pl.CostEstimate(flops=flops, transcendentals=0,
                                      bytes_accessed=bytes_accessed),
    )(x, w1t, w2t, w3t, b_all)

    return out_t[:, :B].T                                    # (B, out) f32


def init_params(key, input_size, hidden_size, output_size):
    """nn.Linear-style init.  Weights stored as (out_features, in_features)
    in bf16 (MXU operand dtype); biases packed into one f32 column."""
    ks = jax.random.split(key, 6)

    def lin(kw, kb, fan_in, fan_out):
        bound = 1.0 / jnp.sqrt(fan_in)  # match nn.Linear default uniform init
        w = jax.random.uniform(kw, (fan_out, fan_in), jnp.float32, -bound, bound)
        b = jax.random.uniform(kb, (fan_out, 1), jnp.float32, -bound, bound)
        return w, b

    w1, b1 = lin(ks[0], ks[1], input_size, hidden_size)
    w2, b2 = lin(ks[2], ks[3], hidden_size, hidden_size)
    w3, b3 = lin(ks[4], ks[5], hidden_size, output_size)
    return dict(
        w1t=w1.astype(jnp.bfloat16),
        w2t=w2.astype(jnp.bfloat16),
        w3t=w3.astype(jnp.bfloat16),
        b_all=jnp.concatenate([b1, b2, b3], axis=0),   # (2H+out, 1) f32
    )


def value_forward_ref(x, params, hidden_size, output_size):
    """Pure-JAX reference with the same bf16-operand / f32-accumulate math.
    NOTE: inputs/activations are quantized to bf16 before each MXU op; this
    deviates slightly from a pure-f32 PyTorch nn.Linear."""
    w1 = params["w1t"].astype(jnp.float32)
    w2 = params["w2t"].astype(jnp.float32)
    w3 = params["w3t"].astype(jnp.float32)
    b_all = params["b_all"]
    b1 = b_all[0:hidden_size, 0]
    b2 = b_all[hidden_size:2 * hidden_size, 0]
    b3 = b_all[2 * hidden_size:2 * hidden_size + output_size, 0]

    xb = x.astype(jnp.bfloat16).astype(jnp.float32)
    h1 = jnp.maximum(xb @ w1.T + b1, 0.0)
    h1 = h1.astype(jnp.bfloat16).astype(jnp.float32)
    h2 = jnp.maximum(h1 @ w2.T + b2, 0.0)
    h2 = h2.astype(jnp.bfloat16).astype(jnp.float32)
    return h2 @ w3.T + b3


if __name__ == "__main__":
    key = jax.random.PRNGKey(0)
    k_x, k_p, k_x2 = jax.random.split(key, 3)

    batch, input_size, hidden_size, output_size = 8, 16, 32, 1
    params = init_params(k_p, input_size, hidden_size, output_size)

    # Small-batch case: single 128-wide (lane-dense) tile.
    x = jax.random.normal(k_x, (batch, input_size), dtype=jnp.float32)
    out = jax.block_until_ready(value_forward(x, params))
    ref = value_forward_ref(x, params, hidden_size, output_size)
    assert out.shape == (batch, output_size)
    assert jnp.allclose(out, ref, atol=5e-3, rtol=5e-3), \
        float(jnp.max(jnp.abs(out - ref)))

    # Larger batch: exercises the batch grid axis (>= 2 tiles for v7x dual-TC,
    # ragged-batch padding, double-buffered pipeline with resident weights).
    big_batch = 300
    x2 = jax.random.normal(k_x2, (big_batch, input_size), dtype=jnp.float32)
    out2 = jax.block_until_ready(value_forward(x2, params))
    ref2 = value_forward_ref(x2, params, hidden_size, output_size)
    assert out2.shape == (big_batch, output_size)
    assert jnp.allclose(out2, ref2, atol=5e-3, rtol=5e-3), \
        float(jnp.max(jnp.abs(out2 - ref2)))

    print("KERNEL_OK")
</pallas_src>

<mosaic_0001>
module attributes {stable_mosaic.version = 11 : i64} {
  func.func @value_mlp_kernel(%arg0: i32, %arg1: memref<128x16xf32, #tpu.memory_space<vmem>>, %arg2: memref<32x16xbf16, #tpu.memory_space<vmem>>, %arg3: memref<32x32xbf16, #tpu.memory_space<vmem>>, %arg4: memref<1x32xbf16, #tpu.memory_space<vmem>>, %arg5: memref<65x1xf32, #tpu.memory_space<vmem>>, %arg6: memref<1x128xf32, #tpu.memory_space<vmem>>) attributes {dimension_semantics = [#tpu.dimension_semantics<parallel>], iteration_bounds = array<i64: 1>, scalar_prefetch = 0 : i64, scratch_operands = 0 : i64, tpu.core_type = #tpu.core_type<tc>, window_params = [{transform_indices = @transform_0, window_bounds = array<i64: 128, 16>}, {pipeline_mode = #tpu.pipeline_mode<synchronous>, transform_indices = @transform_1, window_bounds = array<i64: 32, 16>}, {pipeline_mode = #tpu.pipeline_mode<synchronous>, transform_indices = @transform_2, window_bounds = array<i64: 32, 32>}, {pipeline_mode = #tpu.pipeline_mode<synchronous>, transform_indices = @transform_3, window_bounds = array<i64: 1, 32>}, {pipeline_mode = #tpu.pipeline_mode<synchronous>, transform_indices = @transform_4, window_bounds = array<i64: 65, 1>}, {transform_indices = @transform_5, window_bounds = array<i64: 1, 128>}]} {
    %c0 = arith.constant 0 : index
    %c0_0 = arith.constant 0 : index
    %0 = vector.load %arg1[%c0, %c0_0] : memref<128x16xf32, #tpu.memory_space<vmem>>, vector<128x16xf32>
    %1 = arith.truncf %0 : vector<128x16xf32> to vector<128x16xbf16>
    %c0_1 = arith.constant 0 : index
    %c0_2 = arith.constant 0 : index
    %2 = vector.load %arg5[%c0_1, %c0_2] : memref<65x1xf32, #tpu.memory_space<vmem>>, vector<32x1xf32>
    %c32 = arith.constant 32 : index
    %c0_3 = arith.constant 0 : index
    %3 = vector.load %arg5[%c32, %c0_3] : memref<65x1xf32, #tpu.memory_space<vmem>>, vector<32x1xf32>
    %c64 = arith.constant 64 : index
    %c0_4 = arith.constant 0 : index
    %4 = vector.load %arg5[%c64, %c0_4] : memref<65x1xf32, #tpu.memory_space<vmem>>, vector<1x1xf32>
    %c0_5 = arith.constant 0 : index
    %c0_6 = arith.constant 0 : index
    %5 = vector.load %arg2[%c0_5, %c0_6] : memref<32x16xbf16, #tpu.memory_space<vmem>>, vector<32x16xbf16>
    %cst = arith.constant dense<0.000000e+00> : vector<32x128xf32>
    %6 = tpu.matmul %5, %1, %cst {dimension_numbers = #tpu.dot_dimension_numbers<[1], [1], [0], [0], [0, 0, 1, 0], [], []>} : vector<32x16xbf16>, vector<128x16xbf16>, vector<32x128xf32> -> vector<32x128xf32>
    %7 = vector.broadcast %2 : vector<32x1xf32> to vector<32x128xf32>
    %8 = arith.addf %6, %7 : vector<32x128xf32>
    %cst_7 = arith.constant 0.000000e+00 : f32
    %9 = vector.broadcast %cst_7 : f32 to vector<32x128xf32>
    %10 = arith.maximumf %8, %9 : vector<32x128xf32>
    %c0_8 = arith.constant 0 : index
    %c0_9 = arith.constant 0 : index
    %11 = vector.load %arg3[%c0_8, %c0_9] : memref<32x32xbf16, #tpu.memory_space<vmem>>, vector<32x32xbf16>
    %12 = arith.truncf %10 : vector<32x128xf32> to vector<32x128xbf16>
    %cst_10 = arith.constant dense<0.000000e+00> : vector<32x128xf32>
    %13 = tpu.matmul %11, %12, %cst_10 {dimension_numbers = #tpu.dot_dimension_numbers<[1], [0], [0], [1], [0, 0, 1, 1], [], []>} : vector<32x32xbf16>, vector<32x128xbf16>, vector<32x128xf32> -> vector<32x128xf32>
    %14 = vector.broadcast %3 : vector<32x1xf32> to vector<32x128xf32>
    %15 = arith.addf %13, %14 : vector<32x128xf32>
    %cst_11 = arith.constant 0.000000e+00 : f32
    %16 = vector.broadcast %cst_11 : f32 to vector<32x128xf32>
    %17 = arith.maximumf %15, %16 : vector<32x128xf32>
    %c0_12 = arith.constant 0 : index
    %c0_13 = arith.constant 0 : index
    %18 = vector.load %arg4[%c0_12, %c0_13] : memref<1x32xbf16, #tpu.memory_space<vmem>>, vector<1x32xbf16>
    %19 = arith.truncf %17 : vector<32x128xf32> to vector<32x128xbf16>
    %cst_14 = arith.constant dense<0.000000e+00> : vector<1x128xf32>
    %20 = tpu.matmul %18, %19, %cst_14 {dimension_numbers = #tpu.dot_dimension_numbers<[1], [0], [0], [1], [0, 0, 1, 1], [], []>} : vector<1x32xbf16>, vector<32x128xbf16>, vector<1x128xf32> -> vector<1x128xf32>
    %21 = vector.broadcast %4 : vector<1x1xf32> to vector<1x128xf32>
    %22 = arith.addf %20, %21 : vector<1x128xf32>
    %c0_15 = arith.constant 0 : index
    %c0_16 = arith.constant 0 : index
    %23 = vector.load %arg6[%c0_15, %c0_16] : memref<1x128xf32, #tpu.memory_space<vmem>>, vector<1x128xf32>
    tpu.vector_store %arg6[%c0_15, %c0_16], %22 {strides = array<i32>} : memref<1x128xf32, #tpu.memory_space<vmem>>, vector<1x128xf32>,
    return
  }
  func.func @transform_0(%arg0: i32) -> (i32, i32) {
    %c0_i32 = arith.constant 0 : i32
    %c0_i32_0 = arith.constant 0 : i32
    return %arg0, %c0_i32 : i32, i32
  }
  func.func @transform_1(%arg0: i32) -> (i32, i32) {
    %c0_i32 = arith.constant 0 : i32
    %c0_i32_0 = arith.constant 0 : i32
    %c0_i32_1 = arith.constant 0 : i32
    return %c0_i32, %c0_i32_0 : i32, i32
  }
  func.func @transform_2(%arg0: i32) -> (i32, i32) {
    %c0_i32 = arith.constant 0 : i32
    %c0_i32_0 = arith.constant 0 : i32
    %c0_i32_1 = arith.constant 0 : i32
    return %c0_i32, %c0_i32_0 : i32, i32
  }
  func.func @transform_3(%arg0: i32) -> (i32, i32) {
    %c0_i32 = arith.constant 0 : i32
    %c0_i32_0 = arith.constant 0 : i32
    %c0_i32_1 = arith.constant 0 : i32
    return %c0_i32, %c0_i32_0 : i32, i32
  }
  func.func @transform_4(%arg0: i32) -> (i32, i32) {
    %c0_i32 = arith.constant 0 : i32
    %c0_i32_0 = arith.constant 0 : i32
    %c0_i32_1 = arith.constant 0 : i32
    return %c0_i32, %c0_i32_0 : i32, i32
  }
  func.func @transform_5(%arg0: i32) -> (i32, i32) {
    %c0_i32 = arith.constant 0 : i32
    %c0_i32_0 = arith.constant 0 : i32
    return %c0_i32, %arg0 : i32, i32
  }
}

</mosaic_0001>

<bundles_post_ra>
// kernel: tpu_custom_call.1
= control target key start
LH: loop header
LB: loop body
LE: loop exit
PB: predicated region body
PF: predicated region fallthrough
CT: control target
= control target key end

     0   :  { %vm89_vm0 = vcmask 130048   ;;  %v439_v5 = vmov 0   ;;  %s596_s0 = inlined_call_operand.vmem [shape: f32[128,16], index: 0, kind: input, shape index: {}]   ;;  %s597_s1 = inlined_call_operand.vmem [shape: bf16[32,16], index: 1, kind: input, shape index: {}]   ;;  %s598_s2 = inlined_call_operand.vmem [shape: bf16[32,32], index: 2, kind: input, shape index: {}]   ;;  %s599_s3 = inlined_call_operand.vmem [shape: bf16[1,32], index: 3, kind: input, shape index: {}]   ;;  %s600_s4 = inlined_call_operand.vmem [shape: f32[65,1], index: 4, kind: input, shape index: {}]   ;;  %s601_s5 = inlined_call_operand.hbm [shape: f32[1,128], index: 5, kind: output, shape index: {}]  }
   0x1   :  { %v22_v0 = vld [vmem:[%s596_s0] sm:$0xff]  ;;  %v23_v1 = vld [vmem:[%s596_s0 + $0x8] sm:$0xff]  ;;  %v24_v2 = vld [vmem:[%s596_s0 + $0x10] sm:$0xff]  ;;  %409 = vset.pattern.permute.xlu0 %v439_v5  ;;  %410 = vset.pattern.permute.xlu1 %v439_v5 }
   0x2   :  { %v38_v3 = vpack.c.bf16 %v23_v1, %v22_v0  ;;  %v25_v4 = vld [vmem:[%s596_s0 + $0x18] sm:$0xff]  ;;  %v26_v8 = vld [vmem:[%s596_s0 + $0x20] sm:$0xff]  ;;  %v27_v9 = vld [vmem:[%s596_s0 + $0x28] sm:$0xff] }
   0x3   :  { %v39_v6 = vpack.c.bf16 %v25_v4, %v24_v2  ;;  %v411_v10 = vld [vmem:[%s597_s1] sm:$0xff]   ;;  %v48_v12 = vld [vmem:[%s600_s4 + $0x10] sm:$0xff]  ;;  %v40_v14 = vpack.c.bf16 %v27_v9, %v26_v8  ;;  %v47_v15 = vld [vmem:[%s600_s4 + $0x8] sm:$0xff] }
   0x4   :  { %397 = vmatprep.subr.msk.bf16.mxu0 %vm89_vm0, %v38_v3  ;;  %v97_v7 = vsel %vm89_vm0, %v38_v3, 0  ;;  %v46_v11 = vld [vmem:[%s600_s4] sm:$0xff]  ;;  %377 = vmatprep.mubr.msk.bf16.mxu0 %vm89_vm0, %v411_v10  ;;  %v49_v16 = vld [vmem:[%s600_s4 + $0x18] sm:$0xff] }
   0x5   :  { %362 = vmatpush3.bf16.xpose.msra.mxu0 %v97_v7  ;;  %61 = vperm.xlu0 %409, %v46_v11   ;;  %v100_v13 = vsel %vm89_vm0, %v39_v6, 0 }
   0x6   :  { %398 = vmatprep.subr.msk.bf16.mxu0 %vm89_vm0, %v39_v6  ;;  %71 = vperm.xlu1 %410, %v48_v12  }
   0x7   :  { %10 = vsyncpa [#allocation3], 0  ;;  %v50_v17 = vld [vmem:[%s600_s4 + $0x20] sm:$0xff]  ;;  %v28_v18 = vld [vmem:[%s596_s0 + $0x30] sm:$0xff]  ;;  %v103_v21 = vsel %vm89_vm0, %v40_v14, 0  ;;  %vm209_vm1 = vcmask 261120  }
   0x8   :  { %v29_v19 = vld [vmem:[%s596_s0 + $0x38] sm:$0xff]  ;;  %v51_v20 = vld [vmem:[%s600_s4 + $0x28] sm:$0xff]  ;;  %v52_v23 = vld [vmem:[%s600_s4 + $0x30] sm:$0xff]  ;;  %v440_v0 = vmov 0.0   ;;  %vm441_vm2 = vmmov 0   ;;  %s442_s24 = smov [#allocation2]  }
   0x9   :  { %66 = vperm.xlu0 %409, %v47_v15   ;;  %v41_v22 = vpack.c.bf16 %v29_v19, %v28_v18  ;;  %v53_v24 = vld [vmem:[%s600_s4 + $0x38] sm:$0xff]  ;;  %v54_v25 = vld [vmem:[%s600_s4 + $0x40] sm:$0x1]  ;;  %v31_v27 = vld [vmem:[%s596_s0 + $0x48] sm:$0xff]  ;;  %s327_s25 = sshll.u32 %s442_s24, 4  ;;  %s328_s25 = int_to_ptr.vmem [resolvable:$true] %s327_s25 }
   0xa   :  { %76 = vperm.xlu1 %410, %v49_v16   ;;  %v30_v26 = vld [vmem:[%s596_s0 + $0x40] sm:$0xff]  ;;  %v32_v30 = vld [vmem:[%s596_s0 + $0x50] sm:$0xff]  ;;  %v33_v31 = vld [vmem:[%s596_s0 + $0x58] sm:$0xff]  ;;  %s415_s26 = scalar_lea.vmem %s328_s25, 16  ;;  %s419_s27 = scalar_lea.vmem %s328_s25, 32 }
   0xb   :  { %v106_v28 = vsel %vm89_vm0, %v41_v22, 0  ;;  %v42_v29 = vpack.c.bf16 %v31_v27, %v30_v26  ;;  %v43_v33 = vpack.c.bf16 %v33_v31, %v32_v30  ;;  %v34_v34 = vld [vmem:[%s596_s0 + $0x60] sm:$0xff]  ;;  %v35_v35 = vld [vmem:[%s596_s0 + $0x68] sm:$0xff]  ;;  %v36_v38 = vld [vmem:[%s596_s0 + $0x70] sm:$0xff]  ;;  %p416_p0 = scmp.ne.s32.totalorder %s328_s25, %s415_s26  ;;  %p420_p1 = scmp.lt.s32.totalorder %s328_s25, %s328_s25 }
   0xc   :  { %v44_v37 = vpack.c.bf16 %v35_v35, %v34_v34  ;;  %v37_v39 = vld [vmem:[%s596_s0 + $0x78] sm:$0xff]  ;;  %v412_v43 = vld [vmem:[%s597_s1 + $0x8] sm:$0xff]   ;;  %v413_v44 = vld [vmem:[%s598_s2] sm:$0xff]   ;;  %p421_p2 = scmp.lt.s32.totalorder %s419_s27, %s415_s26 }
   0xd   :  { %364 = vmatpush3.bf16.xpose.msra.mxu0 %v100_v13  ;;  %181 = vperm.xlu0 %409, %v50_v17   ;;  %v109_v32 = vsel %vm89_vm0, %v42_v29, 0  ;;  %v112_v36 = vsel %vm89_vm0, %v43_v33, 0  ;;  %v45_v41 = vpack.c.bf16 %v37_v39, %v36_v38  ;;  %v414_v63 = vld [vmem:[%s598_s2 + $0x8] sm:$0xff]   ;;  %v269_v19 = vld [vmem:[%s599_s3] sm:$0x1] }
   0xe   :  { %399 = vmatprep.subr.msk.bf16.mxu0 %vm89_vm0, %v40_v14  ;;  %186 = vperm.xlu1 %410, %v51_v20   ;;  %v115_v40 = vsel %vm89_vm0, %v44_v37, 0  ;;  %p422_p3 = por %p421_p2, %p420_p1 }
   0xf   :  { %v118_v42 = vsel %vm89_vm0, %v45_v41, 0  ;;  %385 = vmatprep.mubr.msk.bf16.mxu1 %vm209_vm1, %v413_v44 }
  0x10   :  { %p423_p4 = pnand %p422_p3, %p416_p0 }
  0x11   :  { %191 = vperm.xlu0 %409, %v52_v23  }
  0x12   :  { %196 = vperm.xlu1 %410, %v53_v24  }
  0x15   :  { %366 = vmatpush3.bf16.xpose.msra.mxu0 %v103_v21  ;;  %274 = vperm.xlu0 %409, %v54_v25  }
  0x16   :  { %400 = vmatprep.subr.msk.bf16.mxu0 %vm89_vm0, %v41_v22 }
  0x1d   :  { %368 = vmatpush3.bf16.xpose.msra.mxu0 %v106_v28 }
  0x1e   :  { %401 = vmatprep.subr.msk.bf16.mxu0 %vm89_vm0, %v42_v29 }
  0x25   :  { %370 = vmatpush3.bf16.xpose.msra.mxu0 %v109_v32 }
  0x26   :  { %402 = vmatprep.subr.msk.bf16.mxu0 %vm89_vm0, %v43_v33 }
  0x2d   :  { %372 = vmatpush3.bf16.xpose.msra.mxu0 %v112_v36 }
  0x2e   :  { %403 = vmatprep.subr.msk.bf16.mxu0 %vm89_vm0, %v44_v37 }
  0x35   :  { %374 = vmatpush3.bf16.xpose.msra.mxu0 %v115_v40 }
  0x36   :  { %404 = vmatprep.subr.msk.bf16.mxu0 %vm89_vm0, %v45_v41 }
  0x3d   :  { %376 = vmatpush3.bf16.xpose.msra.mxu0 %v118_v42 }
  0x44   :  { %378 = vmatmul.mubr.msk.bf16.vlgmr.msra.gmra.mrb[0].mxu0 %vm89_vm0, %v412_v43 }
  0x84   :  { %v62_v46 = vpop.permute.xlu0 %61 }
  0x85   :  { %v72_v45 = vpop.permute.xlu1 %71 }
  0x88   :  { %v67_v53 = vpop.permute.xlu0 %66 }
  0x89   :  { %v77_v50 = vpop.permute.xlu1 %76 }
  0x8c   :  { %v182_v1 = vpop.permute.xlu0 %181 }
  0x8d   :  { %v187_v2 = vpop.permute.xlu1 %186 }
  0x90   :  { %v192_v3 = vpop.permute.xlu0 %191 }
  0x91   :  { %v197_v7 = vpop.permute.xlu1 %196 }
  0x94   :  { %v275_v20 = vpop.permute.xlu0 %274 }
 0x117   :  { %v379_v47 = vpop.f32.mrb[0].mxu0 }
 0x118   :  { %v163_v48 = vadd.f32 %v379_v47, %v72_v45  ;;  %v154_v49 = vpop.f32.mrb[1].mxu0 }
 0x119   :  { %v155_v51 = vadd.f32 %v154_v49, %v62_v46  ;;  %v380_v52 = vpop.f32.mrb[2].mxu0 }
 0x11a   :  { %v166_v54 = vadd.f32 %v380_v52, %v77_v50  ;;  %v157_v55 = vpop.f32.mrb[3].mxu0  ;;  %v171_v57 = vmax.f32 %v163_v48, 0.0 }
 0x11b   :  { %v158_v56 = vadd.f32 %v157_v55, %v67_v53  ;;  %v169_v59 = vmax.f32 %v155_v51, 0.0 }
 0x11c   :  { %v172_v58 = vmax.f32 %v166_v54, 0.0 }
 0x11d   :  { %v170_v60 = vmax.f32 %v158_v56, 0.0 }
 0x11e   :  { %v178_v61 = vpack.c.bf16 %v172_v58, %v171_v57 }
 0x11f   :  { %v177_v62 = vpack.c.bf16 %v170_v60, %v169_v59 }
 0x121   :  { %381 = vmatprep.subr.bf16.mxu1 %v177_v62 }
 0x122   :  { %382 = vmatpush3.bf16.msra.mxu1 %v177_v62 }
 0x123   :  { %383 = vmatprep.subr.bf16.mxu1 %v178_v61 }
 0x126   :  { %384 = vmatpush3.bf16.msra.mxu1 %v178_v61 }
 0x127   :  { %389 = vmatprep.subr.bf16.mxu1 %v440_v0 }
 0x129   :  { %386 = vmatmul.mubr.msk.bf16.vlgmr.msra.gmra.mrb[0].mxu1 %vm209_vm1, %v414_v63 }
 0x12a   :  { %393 = vmatprep.mubr.msk.bf16.mxu1 %vm441_vm2, %v440_v0 }
 0x1fc   :  { %v387_v4 = vpop.f32.mrb[0].mxu1 }
 0x1fd   :  { %v259_v5 = vadd.f32 %v387_v4, %v192_v3  ;;  %v250_v6 = vpop.f32.mrb[1].mxu1 }
 0x1fe   :  { %v251_v8 = vadd.f32 %v250_v6, %v182_v1  ;;  %v388_v9 = vpop.f32.mrb[2].mxu1 }
 0x1ff   :  { %v262_v10 = vadd.f32 %v388_v9, %v197_v7  ;;  %v253_v11 = vpop.f32.mrb[3].mxu1  ;;  %v267_v13 = vmax.f32 %v259_v5, 0.0 }
 0x200   :  { %v254_v12 = vadd.f32 %v253_v11, %v187_v2  ;;  %v265_v15 = vmax.f32 %v251_v8, 0.0 }
 0x201   :  { %v268_v14 = vmax.f32 %v262_v10, 0.0 }
 0x202   :  { %v266_v16 = vmax.f32 %v254_v12, 0.0 }
 0x203   :  { %v271_v17 = vpack.c.bf16 %v268_v14, %v267_v13 }
 0x204   :  { %v270_v18 = vpack.c.bf16 %v266_v16, %v265_v15 }
 0x206   :  { %390 = vmatpush3.bf16.msra.mxu1 %v270_v18 }
 0x207   :  { %391 = vmatprep.subr.bf16.mxu1 %v440_v0 }
 0x20a   :  { %392 = vmatpush3.bf16.msra.mxu1 %v271_v17 }
 0x20d   :  { %394 = vmatmul.mubr.msk.bf16.vlgmr.msra.gmra.mrb[4].mxu1 %vm209_vm1, %v269_v19 }
 0x2e0   :  { %v314_v21 = vpop.f32.mrb[4].mxu1 }
 0x2e1   :  { %v315_v22 = vadd.f32 %v314_v21, %v275_v20  ;;  %v395_v23 = vpop.f32.mrb[5].mxu1 }
 0x2e2   :  { %v317_v24 = vpop.f32.mrb[6].mxu1 }
 0x2e3   :  { %320 = vst [vmem:[#allocation2] sm:$0x1] %v315_v22  ;;  %v396_v25 = vpop.f32.mrb[7].mxu1 }
 0x2e4   :  { %426 = shalt.err (!%p423_p4)
}
 0x2e5   :  { %s427_s29 = scalar_lea.hbm %s601_s5, 16 }
 0x2e6   :  { %p428_p5 = scmp.ne.s32.totalorder %s601_s5, %s427_s29  ;;  %p431_p6 = scmp.lt.u32.totalorder %s427_s29, %s601_s5 }
 0x2e8   :  { %p433_p7 = pnand %p431_p6, %p428_p5 }
 0x2ea   :  { %436 = shalt.err (!%p433_p7)
}
 0x2eb   :  { %330 = dma.vmem_to_hbm [thread:$0]  %s328_s25, 16, %s601_s5, [#allocation3]  }
 0x2ec   :  { %437 = dma.done.wait [#allocation3], 16  }
 0x2ed   :  { %438 = vsyncadd [#allocation3], 4294967280 }
 0x2ee   :  { %334 = vsyncpa [#allocation3], 1 }

</bundles_post_ra>
